<compile_context>
chip_gen: v5e
topology: v5e:2x2
jax: 0.10.0
libtpu: 0.0.40
codegen_flags: <defaults>
</compile_context>

<pallas_src>
import functools

import jax
import jax.numpy as jnp
import numpy as np
from jax.experimental import pallas as pl
from jax.experimental.pallas import tpu as pltpu


def _round_up(n, m):
    return ((n + m - 1) // m) * m


def _cdiv(a, b):
    return -(-a // b)


# --------------------------------------------------------------------------- #
# Kernel body: one batch tile of the gated layer.
# --------------------------------------------------------------------------- #
def _dgm_kernel(x_ref, s_ref, wx_ref, ws_zgr_ref, whs_ref, b_ref, out_ref, *,
                dim_s, compute_dtype):
    """Fused operands (prepared once on the host):
      wx_ref     : (dim_x , 4*dim_s)  x-path of    Z | G | R | H
      ws_zgr_ref : (dim_s , 3*dim_s)  S-path of    Z | G | R
      whs_ref    : (dim_s ,   dim_s)  (S*R)-path of H
      b_ref      : (1     , 4*dim_s)  fused biases Z | G | R | H  (f32)
    dim_s is the lane-padded feature width (multiple of 128).
    """
    x = x_ref[...].astype(compute_dtype)
    S = s_ref[...]                       # keep an f32 copy for the gating math

    # x-path pre-activations (+ fused bias) for all four gates: one lane-dense matmul.
    pre_x = jnp.dot(x, wx_ref[...], preferred_element_type=jnp.float32) + b_ref[...]
    # S-path for Z, G, R: one lane-dense matmul.
    pre_s = jnp.dot(S.astype(compute_dtype), ws_zgr_ref[...],
                    preferred_element_type=jnp.float32)

    # One wide tanh over the fused (TB, 3*dim_s) slab keeps the EUP pipeline full.
    zgr = jnp.tanh(pre_x[:, :3 * dim_s] + pre_s)
    Z = zgr[:, :dim_s]
    G = zgr[:, dim_s:2 * dim_s]
    R = zgr[:, 2 * dim_s:3 * dim_s]

    # H gate: its S-path uses the re-gated state S * R.
    h_pre = pre_x[:, 3 * dim_s:] + jnp.dot(
        (S * R).astype(compute_dtype), whs_ref[...],
        preferred_element_type=jnp.float32)
    H = jnp.tanh(h_pre)

    out_ref[...] = ((1.0 - G) * H + Z * S).astype(out_ref.dtype)


# --------------------------------------------------------------------------- #
# One-time parameter preparation (hoisted out of the per-call path).
# --------------------------------------------------------------------------- #
def prepare_dgm_params(params, *, matmul_dtype=None):
    """Fuse, lane-pad and (optionally) bf16-cast the gate weights ONCE.

    params: dict with keys 'Z','G','R','H'; each value (Wx, Ws, b) with
    Wx: (dim_x, dim_S), Ws: (dim_S, dim_S), b: (dim_S,)  (torch Linear split
    along its input dim and transposed).
    """
    (wzx, wzs, bz) = params["Z"]
    (wgx, wgs, bg) = params["G"]
    (wrx, wrs, br) = params["R"]
    (whx, whs, bh) = params["H"]

    dim_x, dim_S = wzx.shape
    dim_Sp = _round_up(dim_S, 128)          # lane-dense padded feature width
    if matmul_dtype is None:
        # bf16 matmuls pay off once the layer is MXU-bound; keep f32 for small dim_S.
        matmul_dtype = jnp.bfloat16 if dim_S >= 512 else jnp.float32

    def pad_w(w, rows, cols):
        return jnp.pad(w, ((0, rows - w.shape[0]), (0, cols - w.shape[1])))

    def pad_b(b):
        return jnp.pad(b, (0, dim_Sp - b.shape[0]))

    wx_all = jnp.concatenate(
        [pad_w(w, dim_x, dim_Sp) for w in (wzx, wgx, wrx, whx)],
        axis=1).astype(matmul_dtype)                                   # (dim_x, 4*dim_Sp)
    ws_zgr = jnp.concatenate(
        [pad_w(w, dim_Sp, dim_Sp) for w in (wzs, wgs, wrs)],
        axis=1).astype(matmul_dtype)                                   # (dim_Sp, 3*dim_Sp)
    whs_p = pad_w(whs, dim_Sp, dim_Sp).astype(matmul_dtype)            # (dim_Sp, dim_Sp)
    b_all = jnp.concatenate(
        [pad_b(b) for b in (bz, bg, br, bh)],
        axis=0).reshape(1, 4 * dim_Sp).astype(jnp.float32)             # (1, 4*dim_Sp)

    return {"wx": wx_all, "ws_zgr": ws_zgr, "whs": whs_p, "b": b_all}


# --------------------------------------------------------------------------- #
# Forward pass.
# --------------------------------------------------------------------------- #
@functools.partial(jax.jit, static_argnames=("tile_b",))
def _dgm_forward(x, S, wx, ws_zgr, whs, b, *, tile_b):
    B, dim_x = x.shape
    _, dim_S = S.shape
    dim_Sp = whs.shape[0]
    assert wx.shape == (dim_x, 4 * dim_Sp)

    # Feature padding: fast path when dim_S is already a multiple of 128.
    S_p = S if dim_Sp == dim_S else jnp.pad(S, ((0, 0), (0, dim_Sp - dim_S)))

    # Batch tiling: NO host-side batch padding; the ragged last tile is masked.
    # Round the tile count up to an even number (>1) so a dual-TensorCore chip
    # (v7x) gets balanced work from the "parallel" batch axis.
    n_tiles = max(1, _cdiv(B, tile_b))
    if n_tiles > 1 and n_tiles % 2:
        n_tiles += 1
    TB = min(_round_up(_cdiv(B, n_tiles), 8), _round_up(B, 8))
    grid = (_cdiv(B, TB),)

    kernel = functools.partial(_dgm_kernel, dim_s=dim_Sp, compute_dtype=wx.dtype)

    # VMEM footprint: single-buffered resident weights + double-buffered streams.
    w_item = jnp.dtype(wx.dtype).itemsize
    a_item = jnp.dtype(S.dtype).itemsize
    weight_bytes = (wx.size + ws_zgr.size + whs.size) * w_item + b.size * 4
    stream_bytes = 2 * TB * (dim_x * jnp.dtype(x.dtype).itemsize + dim_Sp * a_item)
    out_bytes = 2 * TB * dim_Sp * a_item
    footprint = weight_bytes + stream_bytes + out_bytes
    try:
        vmem_cap = pltpu.get_tpu_info().vmem_capacity_bytes
    except Exception:
        vmem_cap = 64 * 1024 * 1024        # conservative (v7x per-core physical)
    vmem_limit = int(min(max(2 * footprint, 32 * 1024 * 1024), int(0.75 * vmem_cap)))

    flops = 2 * B * (dim_x * 4 * dim_Sp + dim_Sp * 3 * dim_Sp + dim_Sp * dim_Sp)
    transcendentals = 4 * B * dim_Sp
    bytes_accessed = (x.size * jnp.dtype(x.dtype).itemsize
                      + S_p.size * a_item + weight_bytes + B * dim_Sp * a_item)

    # Resident (constant-index) operands: single VMEM buffer, no double-buffering.
    def resident_spec(shape):
        return pl.BlockSpec(shape, lambda i: (0, 0), pipeline_mode=pl.Buffered(1))

    out_p = pl.pallas_call(
        kernel,
        out_shape=jax.ShapeDtypeStruct((B, dim_Sp), S.dtype),
        grid_spec=pltpu.PrefetchScalarGridSpec(
            num_scalar_prefetch=0,
            grid=grid,
            in_specs=[
                # streamed per batch tile (double-buffered by BlockSpec pipelining)
                pl.BlockSpec((TB, dim_x), lambda i: (i, 0)),
                pl.BlockSpec((TB, dim_Sp), lambda i: (i, 0)),
                # resident fused weights / bias
                resident_spec((dim_x, 4 * dim_Sp)),
                resident_spec((dim_Sp, 3 * dim_Sp)),
                resident_spec((dim_Sp, dim_Sp)),
                resident_spec((1, 4 * dim_Sp)),
            ],
            out_specs=pl.BlockSpec((TB, dim_Sp), lambda i: (i, 0)),
        ),
        compiler_params=pltpu.CompilerParams(
            dimension_semantics=("parallel",),   # batch axis: megacore / dual-TC
            vmem_limit_bytes=vmem_limit,
        ),
        cost_estimate=pl.CostEstimate(
            flops=flops,
            transcendentals=transcendentals,
            bytes_accessed=bytes_accessed,
        ),
    )(x, S_p, wx, ws_zgr, whs, b)

    # Only the feature padding (if any) needs stripping; batch was never padded.
    return out_p if dim_Sp == dim_S else out_p[:, :dim_S]


def dgm_layer(x, S, fused_params, *, tile_b=256):
    """DGM_Layer forward.  x: (B, dim_x), S: (B, dim_S) -> (B, dim_S).

    `fused_params` must come from `prepare_dgm_params` (weights fused/padded once).
    """
    return _dgm_forward(x, S, fused_params["wx"], fused_params["ws_zgr"],
                        fused_params["whs"], fused_params["b"], tile_b=tile_b)


# --------------------------------------------------------------------------- #
# Reference + test harness.
# --------------------------------------------------------------------------- #
def init_gate(key, dim_x, dim_S):
    """PyTorch nn.Linear-style init: U(-1/sqrt(nIn), 1/sqrt(nIn))."""
    n_in = dim_x + dim_S
    bound = 1.0 / np.sqrt(n_in)
    kw, kb = jax.random.split(key)
    # torch weight is (nOut, nIn); store transposed and split by input block.
    w = jax.random.uniform(kw, (n_in, dim_S), jnp.float32, -bound, bound)
    b = jax.random.uniform(kb, (dim_S,), jnp.float32, -bound, bound)
    return w[:dim_x, :], w[dim_x:, :], b


def reference(x, S, params):
    def gate(p, s_in):
        wx, ws, b = p
        return jnp.tanh(x @ wx + s_in @ ws + b)
    Z = gate(params["Z"], S)
    G = gate(params["G"], S)
    R = gate(params["R"], S)
    H = gate(params["H"], S * R)
    return (1.0 - G) * H + Z * S


if __name__ == "__main__":
    key = jax.random.PRNGKey(0)
    kx, ks, kz, kg, kr, kh, kx2, ks2 = jax.random.split(key, 8)

    # Small shapes consistent with the module.
    B, dim_x, dim_S = 8, 4, 32
    x = jax.random.normal(kx, (B, dim_x), jnp.float32)
    S = jax.random.normal(ks, (B, dim_S), jnp.float32)

    params = {
        "Z": init_gate(kz, dim_x, dim_S),
        "G": init_gate(kg, dim_x, dim_S),
        "R": init_gate(kr, dim_x, dim_S),
        "H": init_gate(kh, dim_x, dim_S),
    }

    # Weight fusion / padding happens ONCE here, outside the per-call path.
    fused = prepare_dgm_params(params)

    out = jax.block_until_ready(dgm_layer(x, S, fused))
    ref = reference(x, S, params)
    np.testing.assert_allclose(np.asarray(out), np.asarray(ref),
                               rtol=1e-5, atol=1e-5)

    # Multi-tile + ragged-batch path: grid > 1, last tile partially masked,
    # even tile count for dual-TensorCore balance.
    B2 = 1040
    x2 = jax.random.normal(kx2, (B2, dim_x), jnp.float32)
    S2 = jax.random.normal(ks2, (B2, dim_S), jnp.float32)
    out2 = jax.block_until_ready(dgm_layer(x2, S2, fused, tile_b=256))
    ref2 = reference(x2, S2, params)
    np.testing.assert_allclose(np.asarray(out2), np.asarray(ref2),
                               rtol=1e-5, atol=1e-5)

    # bf16-matmul path (auto-enabled for large dim_S; forced here to validate
    # the numerics against the f32 reference at a bf16-appropriate tolerance).
    fused_bf16 = prepare_dgm_params(params, matmul_dtype=jnp.bfloat16)
    out3 = jax.block_until_ready(dgm_layer(x, S, fused_bf16))
    np.testing.assert_allclose(np.asarray(out3), np.asarray(ref),
                               rtol=3e-2, atol=3e-2)

    print("KERNEL_OK")
</pallas_src>

<mosaic_0001>
module attributes {stable_mosaic.version = 11 : i64} {
  func.func @_dgm_kernel(%arg0: i32, %arg1: memref<8x4xf32, #tpu.memory_space<vmem>>, %arg2: memref<8x128xf32, #tpu.memory_space<vmem>>, %arg3: memref<4x512xf32, #tpu.memory_space<vmem>>, %arg4: memref<128x384xf32, #tpu.memory_space<vmem>>, %arg5: memref<128x128xf32, #tpu.memory_space<vmem>>, %arg6: memref<1x512xf32, #tpu.memory_space<vmem>>, %arg7: memref<8x128xf32, #tpu.memory_space<vmem>>) attributes {dimension_semantics = [#tpu.dimension_semantics<parallel>], iteration_bounds = array<i64: 1>, scalar_prefetch = 0 : i64, scratch_operands = 0 : i64, tpu.core_type = #tpu.core_type<tc>, window_params = [{transform_indices = @transform_0, window_bounds = array<i64: 8, 4>}, {transform_indices = @transform_1, window_bounds = array<i64: 8, 128>}, {pipeline_mode = #tpu.pipeline_mode<synchronous>, transform_indices = @transform_2, window_bounds = array<i64: 4, 512>}, {pipeline_mode = #tpu.pipeline_mode<synchronous>, transform_indices = @transform_3, window_bounds = array<i64: 128, 384>}, {pipeline_mode = #tpu.pipeline_mode<synchronous>, transform_indices = @transform_4, window_bounds = array<i64: 128, 128>}, {pipeline_mode = #tpu.pipeline_mode<synchronous>, transform_indices = @transform_5, window_bounds = array<i64: 1, 512>}, {transform_indices = @transform_6, window_bounds = array<i64: 8, 128>}]} {
    %c0 = arith.constant 0 : index
    %c0_0 = arith.constant 0 : index
    %0 = vector.load %arg1[%c0, %c0_0] : memref<8x4xf32, #tpu.memory_space<vmem>>, vector<8x4xf32>
    %c0_1 = arith.constant 0 : index
    %c0_2 = arith.constant 0 : index
    %1 = vector.load %arg2[%c0_1, %c0_2] : memref<8x128xf32, #tpu.memory_space<vmem>>, vector<8x128xf32>
    %c0_3 = arith.constant 0 : index
    %c0_4 = arith.constant 0 : index
    %2 = vector.load %arg3[%c0_3, %c0_4] : memref<4x512xf32, #tpu.memory_space<vmem>>, vector<4x512xf32>
    %cst = arith.constant dense<0.000000e+00> : vector<8x512xf32>
    %3 = tpu.matmul %0, %2, %cst {dimension_numbers = #tpu.dot_dimension_numbers<[1], [0], [0], [1], [0, 0, 1, 1], [], []>} : vector<8x4xf32>, vector<4x512xf32>, vector<8x512xf32> -> vector<8x512xf32>
    %c0_5 = arith.constant 0 : index
    %c0_6 = arith.constant 0 : index
    %4 = vector.load %arg6[%c0_5, %c0_6] : memref<1x512xf32, #tpu.memory_space<vmem>>, vector<1x512xf32>
    %5 = vector.broadcast %4 : vector<1x512xf32> to vector<8x512xf32>
    %6 = arith.addf %3, %5 : vector<8x512xf32>
    %c0_7 = arith.constant 0 : index
    %c0_8 = arith.constant 0 : index
    %7 = vector.load %arg4[%c0_7, %c0_8] : memref<128x384xf32, #tpu.memory_space<vmem>>, vector<128x384xf32>
    %cst_9 = arith.constant dense<0.000000e+00> : vector<8x384xf32>
    %8 = tpu.matmul %1, %7, %cst_9 {dimension_numbers = #tpu.dot_dimension_numbers<[1], [0], [0], [1], [0, 0, 1, 1], [], []>} : vector<8x128xf32>, vector<128x384xf32>, vector<8x384xf32> -> vector<8x384xf32>
    %9 = vector.extract_strided_slice %6 {offsets = [0, 0], sizes = [8, 384], strides = [1, 1]} : vector<8x512xf32> to vector<8x384xf32>
    %10 = arith.addf %9, %8 : vector<8x384xf32>
    %11 = math.tanh %10 : vector<8x384xf32>
    %12 = vector.extract_strided_slice %11 {offsets = [0, 0], sizes = [8, 128], strides = [1, 1]} : vector<8x384xf32> to vector<8x128xf32>
    %13 = vector.extract_strided_slice %11 {offsets = [0, 128], sizes = [8, 128], strides = [1, 1]} : vector<8x384xf32> to vector<8x128xf32>
    %14 = vector.extract_strided_slice %11 {offsets = [0, 256], sizes = [8, 128], strides = [1, 1]} : vector<8x384xf32> to vector<8x128xf32>
    %15 = vector.extract_strided_slice %6 {offsets = [0, 384], sizes = [8, 128], strides = [1, 1]} : vector<8x512xf32> to vector<8x128xf32>
    %16 = arith.mulf %1, %14 : vector<8x128xf32>
    %c0_10 = arith.constant 0 : index
    %c0_11 = arith.constant 0 : index
    %17 = vector.load %arg5[%c0_10, %c0_11] : memref<128x128xf32, #tpu.memory_space<vmem>>, vector<128x128xf32>
    %cst_12 = arith.constant dense<0.000000e+00> : vector<8x128xf32>
    %18 = tpu.matmul %16, %17, %cst_12 {dimension_numbers = #tpu.dot_dimension_numbers<[1], [0], [0], [1], [0, 0, 1, 1], [], []>} : vector<8x128xf32>, vector<128x128xf32>, vector<8x128xf32> -> vector<8x128xf32>
    %19 = arith.addf %15, %18 : vector<8x128xf32>
    %20 = math.tanh %19 : vector<8x128xf32>
    %cst_13 = arith.constant 1.000000e+00 : f32
    %21 = vector.broadcast %cst_13 : f32 to vector<8x128xf32>
    %22 = arith.subf %21, %13 : vector<8x128xf32>
    %23 = arith.mulf %22, %20 : vector<8x128xf32>
    %24 = arith.mulf %12, %1 : vector<8x128xf32>
    %25 = arith.addf %23, %24 : vector<8x128xf32>
    %c0_14 = arith.constant 0 : index
    %c0_15 = arith.constant 0 : index
    %26 = vector.load %arg7[%c0_14, %c0_15] : memref<8x128xf32, #tpu.memory_space<vmem>>, vector<8x128xf32>
    tpu.vector_store %arg7[%c0_14, %c0_15], %25 {strides = array<i32>} : memref<8x128xf32, #tpu.memory_space<vmem>>, vector<8x128xf32>,
    return
  }
  func.func @transform_0(%arg0: i32) -> (i32, i32) {
    %c0_i32 = arith.constant 0 : i32
    %c0_i32_0 = arith.constant 0 : i32
    return %arg0, %c0_i32 : i32, i32
  }
  func.func @transform_1(%arg0: i32) -> (i32, i32) {
    %c0_i32 = arith.constant 0 : i32
    %c0_i32_0 = arith.constant 0 : i32
    return %arg0, %c0_i32 : i32, i32
  }
  func.func @transform_2(%arg0: i32) -> (i32, i32) {
    %c0_i32 = arith.constant 0 : i32
    %c0_i32_0 = arith.constant 0 : i32
    %c0_i32_1 = arith.constant 0 : i32
    return %c0_i32, %c0_i32_0 : i32, i32
  }
  func.func @transform_3(%arg0: i32) -> (i32, i32) {
    %c0_i32 = arith.constant 0 : i32
    %c0_i32_0 = arith.constant 0 : i32
    %c0_i32_1 = arith.constant 0 : i32
    return %c0_i32, %c0_i32_0 : i32, i32
  }
  func.func @transform_4(%arg0: i32) -> (i32, i32) {
    %c0_i32 = arith.constant 0 : i32
    %c0_i32_0 = arith.constant 0 : i32
    %c0_i32_1 = arith.constant 0 : i32
    return %c0_i32, %c0_i32_0 : i32, i32
  }
  func.func @transform_5(%arg0: i32) -> (i32, i32) {
    %c0_i32 = arith.constant 0 : i32
    %c0_i32_0 = arith.constant 0 : i32
    %c0_i32_1 = arith.constant 0 : i32
    return %c0_i32, %c0_i32_0 : i32, i32
  }
  func.func @transform_6(%arg0: i32) -> (i32, i32) {
    %c0_i32 = arith.constant 0 : i32
    %c0_i32_0 = arith.constant 0 : i32
    return %arg0, %c0_i32 : i32, i32
  }
}

</mosaic_0001>

<bundles_post_ra>
// kernel: _dgm_forward.1
= control target key start
LH: loop header
LB: loop body
LE: loop exit
PB: predicated region body
PF: predicated region fallthrough
CT: control target
= control target key end

     0   :  { %11 = vsyncpa [#allocation3], 0  ;;  %s536_s0 = inlined_call_operand.vmem [shape: f32[8,4], index: 0, kind: input, shape index: {}]   ;;  %s537_s1 = inlined_call_operand.vmem [shape: f32[8,128], index: 1, kind: input, shape index: {}]   ;;  %s538_s2 = inlined_call_operand.vmem [shape: f32[4,512], index: 2, kind: input, shape index: {}]   ;;  %s539_s3 = inlined_call_operand.hbm [shape: f32[128,384], index: 3, kind: input, shape index: {}]   ;;  %s540_s4 = inlined_call_operand.hbm [shape: f32[128,128], index: 4, kind: input, shape index: {}]   ;;  %s541_s5 = inlined_call_operand.vmem [shape: f32[1,512], index: 5, kind: input, shape index: {}]   ;;  %s542_s6 = inlined_call_operand.hbm [shape: f32[8,128], index: 6, kind: output, shape index: {}]  }
   0x1   :  { %12 = vsyncpa [#allocation6], 0 }
   0x2   :  { %13 = vsyncpa [#allocation4], 0  ;;  %s24_s23 = sshll.u32 %s539_s3, 4  ;;  %s449_s24 = smov [#allocation2]   ;;  %s25_s23 = int_to_ptr.hbm [resolvable:$true] %s24_s23 }
   0x3   :  { %s26_s25 = sshll.u32 %s449_s24, 4  ;;  %s37_s28 = sshll.u32 %s540_s4, 4  ;;  %s27_s25 = int_to_ptr.vmem [resolvable:$true] %s26_s25  ;;  %s38_s28 = int_to_ptr.hbm [resolvable:$true] %s37_s28 }
   0x4   :  { %s450_s29 = smov 384   ;;  %s451_s30 = smov 24  }
   0x5   :  { %32 = dma.hbm_to_vmem [thread:$0]  %s25_s23, 6144, %s27_s25, [#allocation3], %s450_s29, %s450_s29, %s451_s30  }
   0x6   :  { %s452_s7 = smov [#allocation5]   ;;  %s453_s9 = smov 128  }
   0x7   :  { %s39_s8 = sshll.u32 %s452_s7, 4  ;;  %s454_s10 = smov 8   ;;  %s40_s8 = int_to_ptr.vmem [resolvable:$true] %s39_s8 }
   0x8   :  { %45 = dma.hbm_to_vmem [thread:$0]  %s38_s28, 2048, %s40_s8, [#allocation6], %s453_s9, %s453_s9, %s454_s10  }
   0x9   :  { %443 = dma.done.wait [#allocation3], 6144  }
   0xa   :  { %444 = vsyncadd [#allocation3], 4294961152 }
   0xb   :  { %445 = dma.done.wait [#allocation6], 2048  }
   0xc   :  { %446 = vsyncadd [#allocation6], 4294965248  ;;  %v59_v0 = vld [vmem:[%s538_s2 + $0x8] sm:$0xff]  ;;  %vm83_vm0 = vcmask 1043456   ;;  %v219_v1 = vld [vmem:[#allocation2 + $0x178] sm:$0xff]  ;;  %vm79_vm1 = vcmask 31744  }
   0xd   :  { %74 = vst [vmem:[#allocation1 + $0x10] ss:$2 sm:$0xff] %v59_v0  ;;  %v503_v3 = vld [vmem:[%s536_s0] sm:$0xff]  ;;  %v216_v4 = vld [vmem:[#allocation2 + $0x160] sm:$0xff]  ;;  %v213_v8 = vld [vmem:[#allocation2 + $0x148] sm:$0xff]  ;;  %s337_s19 = sshll.u32 %s542_s6, 4  ;;  %s338_s19 = int_to_ptr.hbm [resolvable:$true] %s337_s19 }
   0xe   :  { %v58_v5 = vld [vmem:[%s538_s2] sm:$0xff]  ;;  %v301_v9 = vld [vmem:[#allocation5 + $0x70] sm:$0xff]  ;;  %v300_v10 = vld [vmem:[#allocation5 + $0x68] sm:$0xff] }
   0xf   :  { %72 = vst [vmem:[#allocation1] ss:$2 sm:$0xff] %v58_v5  ;;  %v302_v7 = vld [vmem:[#allocation5 + $0x78] sm:$0xff]  ;;  %v210_v11 = vld [vmem:[#allocation2 + $0x130] sm:$0xff]  ;;  %v299_v12 = vld [vmem:[#allocation5 + $0x60] sm:$0xff] }
  0x10   :  { %v207_v13 = vld [vmem:[#allocation2 + $0x118] sm:$0xff]  ;;  %v204_v14 = vld [vmem:[#allocation2 + $0x100] sm:$0xff]  ;;  %v218_v15 = vld [vmem:[#allocation2 + $0x170] sm:$0xff] }
  0x11   :  { %v217_v16 = vld [vmem:[#allocation2 + $0x168] sm:$0xff]  ;;  %v215_v19 = vld [vmem:[#allocation2 + $0x158] sm:$0xff]  ;;  %v214_v22 = vld [vmem:[#allocation2 + $0x150] sm:$0xff] }
  0x12   :  { %v298_v20 = vld [vmem:[#allocation5 + $0x58] sm:$0xff]  ;;  %v201_v21 = vld [vmem:[#allocation2 + $0xe8] sm:$0xff]  ;;  %v212_v23 = vld [vmem:[#allocation2 + $0x140] sm:$0xff] }
  0x13   :  { %v297_v24 = vld [vmem:[#allocation5 + $0x50] sm:$0xff]  ;;  %v211_v26 = vld [vmem:[#allocation2 + $0x138] sm:$0xff]  ;;  %v209_v27 = vld [vmem:[#allocation2 + $0x128] sm:$0xff] }
  0x14   :  { %v77_v2 = vld.sshfl [vmem:[#allocation1 + $0x10] sm:$0xff pattern:$0x75316420]  ;;  %v78_v6 = vld.sshfl [vmem:[#allocation1 + $0x18] sm:$0xff pattern:$0x75316420] }
  0x15   :  { %352 = vmatpush.msk.msra.mxu2 %vm83_vm0, %v77_v2  ;;  %354 = vmatpush.msk.msra.mxu3 %vm83_vm0, %v78_v6  ;;  %v198_v25 = vld [vmem:[#allocation2 + $0xd0] sm:$0xff]  ;;  %v195_v28 = vld [vmem:[#allocation2 + $0xb8] sm:$0xff]  ;;  %v208_v29 = vld [vmem:[#allocation2 + $0x120] sm:$0xff] }
  0x16   :  { %353 = vmatmul.msk.f32.vlgmr.msra.gmra.mxu2 %vm79_vm1, %v503_v3  ;;  %355 = vmatmul.msk.f32.vlgmr.msra.gmra.mxu3 %vm79_vm1, %v503_v3  ;;  %v76_v17 = vld.sshfl [vmem:[#allocation1 + $0x8] sm:$0xff pattern:$0x75316420]  ;;  %v75_v18 = vld.sshfl [vmem:[#allocation1] sm:$0xff pattern:$0x75316420] }
  0x17   :  { %260 = vmatpush.msrb.mxu2 %v219_v1  ;;  %303 = vmatpush.msrb.mxu3 %v302_v7  ;;  %v206_v30 = vld [vmem:[#allocation2 + $0x110] sm:$0xff]  ;;  %v192_v31 = vld [vmem:[#allocation2 + $0xa0] sm:$0xff]  ;;  %v205_v32 = vld [vmem:[#allocation2 + $0x108] sm:$0xff] }
  0x18   :  { %350 = vmatpush.msk.msra.mxu1 %vm83_vm0, %v76_v17  ;;  %348 = vmatpush.msk.msra.mxu0 %vm83_vm0, %v75_v18  ;;  %v203_v33 = vld [vmem:[#allocation2 + $0xf8] sm:$0xff]  ;;  %v189_v34 = vld [vmem:[#allocation2 + $0x88] sm:$0xff]  ;;  %v202_v35 = vld [vmem:[#allocation2 + $0xf0] sm:$0xff] }
  0x19   :  { %261 = vmatpush.msrb.mxu2 %v216_v4  ;;  %304 = vmatpush.msrb.mxu3 %v301_v9  ;;  %v200_v36 = vld [vmem:[#allocation2 + $0xe0] sm:$0xff]  ;;  %v186_v37 = vld [vmem:[#allocation2 + $0x70] sm:$0xff]  ;;  %v183_v38 = vld [vmem:[#allocation2 + $0x58] sm:$0xff] }
  0x1a   :  { %240 = vmatpush.msrb.mxu1 %v218_v15  ;;  %220 = vmatpush.msrb.mxu0 %v217_v16  ;;  %v180_v39 = vld [vmem:[#allocation2 + $0x40] sm:$0xff]  ;;  %v177_v40 = vld [vmem:[#allocation2 + $0x28] sm:$0xff]  ;;  %v174_v41 = vld [vmem:[#allocation2 + $0x10] sm:$0xff] }
  0x1b   :  { %262 = vmatpush.msrb.mxu2 %v213_v8  ;;  %305 = vmatpush.msrb.mxu3 %v300_v10  ;;  %v523_v42 = vld [vmem:[%s537_s1] sm:$0xff]  ;;  %v197_v44 = vld [vmem:[#allocation2 + $0xc8] sm:$0xff]  ;;  %v196_v46 = vld [vmem:[#allocation2 + $0xc0] sm:$0xff] }
  0x1c   :  { %241 = vmatpush.msrb.mxu1 %v215_v19  ;;  %221 = vmatpush.msrb.mxu0 %v214_v22  ;;  %v199_v43 = vld [vmem:[#allocation2 + $0xd8] sm:$0xff]  ;;  %v296_v45 = vld [vmem:[#allocation5 + $0x48] sm:$0xff]  ;;  %v194_v47 = vld [vmem:[#allocation2 + $0xb0] sm:$0xff] }
  0x1d   :  { %263 = vmatpush.msrb.mxu2 %v210_v11  ;;  %306 = vmatpush.msrb.mxu3 %v299_v12  ;;  %v295_v48 = vld [vmem:[#allocation5 + $0x40] sm:$0xff]  ;;  %v193_v49 = vld [vmem:[#allocation2 + $0xa8] sm:$0xff]  ;;  %v191_v50 = vld [vmem:[#allocation2 + $0x98] sm:$0xff] }
  0x1e   :  { %242 = vmatpush.msrb.mxu1 %v212_v23  ;;  %222 = vmatpush.msrb.mxu0 %v211_v26  ;;  %v294_v51 = vld [vmem:[#allocation5 + $0x38] sm:$0xff]  ;;  %v190_v52 = vld [vmem:[#allocation2 + $0x90] sm:$0xff]  ;;  %v188_v53 = vld [vmem:[#allocation2 + $0x80] sm:$0xff] }
  0x1f   :  { %264 = vmatpush.msrb.mxu2 %v207_v13  ;;  %307 = vmatpush.msrb.mxu3 %v298_v20  ;;  %v293_v54 = vld [vmem:[#allocation5 + $0x30] sm:$0xff]  ;;  %v187_v55 = vld [vmem:[#allocation2 + $0x78] sm:$0xff]  ;;  %v185_v56 = vld [vmem:[#allocation2 + $0x68] sm:$0xff] }
  0x20   :  { %243 = vmatpush.msrb.mxu1 %v209_v27  ;;  %349 = vmatmul.msk.f32.vlgmr.msra.gmra.mxu0 %vm79_vm1, %v503_v3  ;;  %v292_v57 = vld [vmem:[#allocation5 + $0x28] sm:$0xff]  ;;  %v184_v58 = vld [vmem:[#allocation2 + $0x60] sm:$0xff]  ;;  %v182_v59 = vld [vmem:[#allocation2 + $0x50] sm:$0xff] }
  0x21   :  { %265 = vmatpush.msrb.mxu2 %v204_v14  ;;  %308 = vmatpush.msrb.mxu3 %v297_v24  ;;  %v291_v60 = vld [vmem:[#allocation5 + $0x20] sm:$0xff]  ;;  %v181_v61 = vld [vmem:[#allocation2 + $0x48] sm:$0xff]  ;;  %v179_v62 = vld [vmem:[#allocation2 + $0x38] sm:$0xff] }
  0x22   :  { %223 = vmatpush.msrb.mxu0 %v208_v29  ;;  %244 = vmatpush.msrb.mxu1 %v206_v30  ;;  %v290_v63 = vld [vmem:[#allocation5 + $0x18] sm:$0xff]  ;;  %v178_v0 = vld [vmem:[#allocation2 + $0x30] sm:$0xff]  ;;  %v176_v1 = vld [vmem:[#allocation2 + $0x20] sm:$0xff] }
  0x23   :  { %266 = vmatpush.msrb.mxu2 %v201_v21  ;;  %351 = vmatmul.msk.f32.vlgmr.msra.gmra.mxu1 %vm79_vm1, %v503_v3  ;;  %v289_v2 = vld [vmem:[#allocation5 + $0x10] sm:$0xff]  ;;  %v175_v3 = vld [vmem:[#allocation2 + $0x18] sm:$0xff]  ;;  %v173_v4 = vld [vmem:[#allocation2 + $0x8] sm:$0xff] }
  0x24   :  { %224 = vmatpush.msrb.mxu0 %v205_v32  ;;  %245 = vmatpush.msrb.mxu1 %v203_v33  ;;  %v288_v5 = vld [vmem:[#allocation5 + $0x8] sm:$0xff]  ;;  %v172_v6 = vld [vmem:[#allocation2] sm:$0xff]  ;;  %v60_v9 = vld [vmem:[%s541_s5] sm:$0xf]  ;;  %s455_s5 = smov [#allocation7]  }
  0x25   :  { %267 = vmatpush.msrb.mxu2 %v198_v25  ;;  %309 = vmatpush.msrb.mxu3 %v296_v45  ;;  %v287_v7 = vld [vmem:[#allocation5] sm:$0xff]  ;;  %v64_v10 = vperm.slane %v60_v9, 2  ;;  %v63_v18 = vperm.slane %v60_v9, 1  ;;  %v62_v19 = vperm.slane %v60_v9, 0  ;;  %v65_v25 = vperm.slane %v60_v9, 3  ;;  %s335_s16 = sshll.u32 %s455_s5, 4  ;;  %s336_s16 = int_to_ptr.vmem [resolvable:$true] %s335_s16 }
  0x26   :  { %225 = vmatpush.msrb.mxu0 %v202_v35  ;;  %246 = vmatpush.msrb.mxu1 %v200_v36 }
  0x27   :  { %268 = vmatpush.msrb.mxu2 %v195_v28  ;;  %310 = vmatpush.msrb.mxu3 %v295_v48 }
  0x28   :  { %226 = vmatpush.msrb.mxu0 %v199_v43  ;;  %247 = vmatpush.msrb.mxu1 %v197_v44 }
  0x29   :  { %269 = vmatpush.msrb.mxu2 %v192_v31  ;;  %311 = vmatpush.msrb.mxu3 %v294_v51 }
  0x2a   :  { %227 = vmatpush.msrb.mxu0 %v196_v46  ;;  %248 = vmatpush.msrb.mxu1 %v194_v47 }
  0x2b   :  { %270 = vmatpush.msrb.mxu2 %v189_v34  ;;  %312 = vmatpush.msrb.mxu3 %v293_v54 }
  0x2c   :  { %228 = vmatpush.msrb.mxu0 %v193_v49  ;;  %249 = vmatpush.msrb.mxu1 %v191_v50 }
  0x2d   :  { %271 = vmatpush.msrb.mxu2 %v186_v37  ;;  %313 = vmatpush.msrb.mxu3 %v292_v57 }
  0x2e   :  { %229 = vmatpush.msrb.mxu0 %v190_v52  ;;  %250 = vmatpush.msrb.mxu1 %v188_v53 }
  0x2f   :  { %272 = vmatpush.msrb.mxu2 %v183_v38  ;;  %314 = vmatpush.msrb.mxu3 %v291_v60 }
  0x30   :  { %230 = vmatpush.msrb.mxu0 %v187_v55  ;;  %251 = vmatpush.msrb.mxu1 %v185_v56 }
  0x31   :  { %273 = vmatpush.msrb.mxu2 %v180_v39  ;;  %315 = vmatpush.msrb.mxu3 %v290_v63 }
  0x32   :  { %231 = vmatpush.msrb.mxu0 %v184_v58  ;;  %252 = vmatpush.msrb.mxu1 %v182_v59 }
  0x33   :  { %274 = vmatpush.msrb.mxu2 %v177_v40  ;;  %316 = vmatpush.msrb.mxu3 %v289_v2 }
  0x34   :  { %232 = vmatpush.msrb.mxu0 %v181_v61  ;;  %253 = vmatpush.msrb.mxu1 %v179_v62 }
  0x35   :  { %275 = vmatpush.msrb.mxu2 %v174_v41  ;;  %317 = vmatpush.msrb.mxu3 %v288_v5 }
  0x36   :  { %276 = vmatmul.f32.vlgmr.msrb.gmra.mxu2 %v523_v42  ;;  %233 = vmatpush.msrb.mxu0 %v178_v0 }
  0x37   :  { %254 = vmatpush.msrb.mxu1 %v176_v1  ;;  %318 = vmatpush.msrb.mxu3 %v287_v7 }
  0x38   :  { %234 = vmatpush.msrb.mxu0 %v175_v3 }
  0x39   :  { %255 = vmatpush.msrb.mxu1 %v173_v4 }
  0x3a   :  { %256 = vmatmul.f32.vlgmr.msrb.gmra.mxu1 %v523_v42  ;;  %235 = vmatpush.msrb.mxu0 %v172_v6 }
  0x3b   :  { %236 = vmatmul.f32.vlgmr.msrb.gmra.mxu0 %v523_v42 }
  0x99   :  { %v149_v8 = vpop.f32.mrf.mxu2  ;;  %v169_v20 = vpop.f32.mrf.mxu3 }
  0x9a   :  { %v150_v11 = vadd.f32 %v149_v8, %v64_v10  ;;  %v170_v28 = vadd.f32 %v169_v20, %v65_v25 }
  0x9d   :  { %v109_v17 = vpop.f32.mrf.mxu0 }
  0x9e   :  { %v110_v23 = vadd.f32 %v109_v17, %v62_v19 }
  0xa0   :  { %v129_v16 = vpop.f32.mrf.mxu1 }
  0xa1   :  { %v130_v21 = vadd.f32 %v129_v16, %v63_v18 }
  0xb7   :  { %v257_v22 = vpop.f32.mrf.mxu1 }
  0xb8   :  { %v237_v24 = vpop.f32.mrf.mxu0  ;;  %v281_v26 = vadd.f32 %v257_v22, %v130_v21 }
  0xb9   :  { %v277_v12 = vpop.f32.mrf.mxu2  ;;  %v280_v27 = vadd.f32 %v237_v24, %v110_v23 }
  0xba   :  { %v282_v13 = vadd.f32 %v277_v12, %v150_v11 }
  0xbc   :  { %363 = vtanh.f32 %v282_v13 }
  0xbd   :  { %365 = vtanh.f32 %v281_v26 }
  0xbe   :  { %367 = vtanh.f32 %v280_v27 }
  0xc2   :  { %v364_v14 = vpop.eup %363 }
  0xc3   :  { %v286_v15 = vmul.f32 %v364_v14, %v523_v42  ;;  %v366_v31 = vpop.eup %365 }
  0xc4   :  { %v368_v32 = vpop.eup %367  ;;  %v325_v33 = vsub.f32 1.0, %v366_v31 }
  0xc5   :  { %319 = vmatmul.f32.vlgmr.msrb.gmra.mxu3 %v286_v15  ;;  %v327_v36 = vmul.f32 %v368_v32, %v523_v42 }
 0x148   :  { %v320_v29 = vpop.f32.mrf.mxu3 }
 0x149   :  { %v323_v30 = vadd.f32 %v320_v29, %v170_v28 }
 0x14b   :  { %369 = vtanh.f32 %v323_v30 }
 0x151   :  { %v370_v34 = vpop.eup %369 }
 0x152   :  { %v326_v35 = vmul.f32 %v370_v34, %v325_v33 }
 0x154   :  { %v328_v37 = vadd.f32 %v327_v36, %v326_v35 }
 0x156   :  { %329 = vst [vmem:[#allocation7] sm:$0xff] %v328_v37 }
 0x157   :  { %340 = dma.vmem_to_hbm [thread:$0]  %s336_s16, 128, %s338_s19, [#allocation4]  }
 0x158   :  { %447 = dma.done.wait [#allocation4], 128  }
 0x159   :  { %448 = vsyncadd [#allocation4], 4294967168 }
 0x15a   :  { %345 = vsyncpa [#allocation3], 1 }
 0x15b   :  { %346 = vsyncpa [#allocation6], 1 }
 0x15c   :  { %347 = vsyncpa [#allocation4], 1 }

</bundles_post_ra>
